<compile_context>
chip_gen: v7x
topology: tpu7x:2x2x1
jax: 0.10.0
libtpu: 0.0.40
codegen_flags: <defaults>
</compile_context>

<pallas_src>
import jax
import jax.numpy as jnp
from jax.experimental import pallas as pl
from jax.experimental.pallas import tpu as pltpu

# fc1..fc6 feature sizes (in, ..., out), matching the PyTorch module.
LAYER_DIMS = (784, 20, 40, 60, 50, 30, 10)
NUM_LAYERS = len(LAYER_DIMS) - 1
LANES = 128                      # all hidden/output dims are padded to 128 lanes

# Packed weight layout: one (W_TOTAL_ROWS, 128) array.
#   layer 0: rows [0, 784)           (K = 784, true input width)
#   layer i>0: rows of length 128    (K padded to 128; padded rows are zero)
W_KDIMS = [LAYER_DIMS[0]] + [LANES] * (NUM_LAYERS - 1)
W_OFFSETS = [0]
for _k in W_KDIMS[:-1]:
    W_OFFSETS.append(W_OFFSETS[-1] + _k)
W_TOTAL_ROWS = sum(W_KDIMS)      # 784 + 5*128 = 1424 (multiple of 8)

VMEM_LIMIT_BYTES = 48 * 1024 * 1024   # safe on v5e/v6e (128 MiB) and v7x (64 MiB/TC)


def deep_mlp_kernel(x_ref, wpack_ref, bpack_ref, out_ref):
    # x_ref:     [TB, 784]
    # wpack_ref: [W_TOTAL_ROWS, 128]  zero-padded, lane-dense packed weights
    # bpack_ref: [8, 128]             row li = bias of layer li (zero-padded)
    # out_ref:   [TB, 128]            cols 10..127 are zeros (sliced off outside)
    h = x_ref[...].astype(jnp.float32)
    for li in range(NUM_LAYERS):
        off, kd = W_OFFSETS[li], W_KDIMS[li]
        w = wpack_ref[off:off + kd, :]            # static, 8-aligned slice
        b = bpack_ref[li:li + 1, :]               # (1, 128)
        y = jnp.dot(h.astype(w.dtype), w, preferred_element_type=jnp.float32) + b
        h = jnp.maximum(y, 0.0) if li != NUM_LAYERS - 1 else y
    out_ref[...] = h.astype(out_ref.dtype)


def _pack_params(weights, biases, matmul_dtype):
    """weights[i]: [d_out, d_in]; biases[i]: [d_out] (PyTorch layout)."""
    wpack = jnp.zeros((W_TOTAL_ROWS, LANES), jnp.float32)
    bpack = jnp.zeros((8, LANES), jnp.float32)
    for li, (w, b) in enumerate(zip(weights, biases)):
        d_in, d_out = LAYER_DIMS[li], LAYER_DIMS[li + 1]
        assert w.shape == (d_out, d_in), f"fc{li+1} weight shape {w.shape}"
        assert b.shape == (d_out,), f"fc{li+1} bias shape {b.shape}"
        wt = w.T.astype(jnp.float32)              # [d_in, d_out]
        wpack = wpack.at[W_OFFSETS[li]:W_OFFSETS[li] + d_in, :d_out].set(wt)
        bpack = bpack.at[li, :d_out].set(b.astype(jnp.float32))
    return wpack.astype(matmul_dtype), bpack


def deep_mlp(x, weights, biases, *, tb=2048, matmul_dtype=jnp.float32):
    """x: [B, 784] -> [B, 10].  matmul_dtype=jnp.bfloat16 recommended on v5e."""
    B, D = x.shape
    assert D == LAYER_DIMS[0], f"expected {LAYER_DIMS[0]} input features, got {D}"
    assert len(weights) == NUM_LAYERS and len(biases) == NUM_LAYERS

    wpack, bpack = _pack_params(weights, biases, matmul_dtype)

    # Pad the batch only up to a multiple of 8 (sublane) -- never to TB.
    B8 = ((B + 7) // 8) * 8
    x_in = jnp.pad(x, ((0, B8 - B), (0, 0))) if B8 != B else x

    TB = min(int(tb), B8)
    TB = (TB // 8) * 8
    n_blk = pl.cdiv(B8, TB)
    # v7x: make sure the "parallel" batch axis has >=2 blocks for both TCs,
    # when the batch is big enough to be worth the extra grid step.
    if n_blk == 1 and B8 >= 256:
        TB = ((B8 // 2 + 7) // 8) * 8
        n_blk = pl.cdiv(B8, TB)

    x_spec = pl.BlockSpec((TB, D), lambda i: (i, 0))
    # Constant index_maps -> packed params stay resident in VMEM across steps.
    wpack_spec = pl.BlockSpec((W_TOTAL_ROWS, LANES), lambda i: (0, 0))
    bpack_spec = pl.BlockSpec((8, LANES), lambda i: (0, 0))
    out_spec = pl.BlockSpec((TB, LANES), lambda i: (i, 0))

    flops = 2 * B8 * sum(LAYER_DIMS[i] * LAYER_DIMS[i + 1] for i in range(NUM_LAYERS))
    bytes_accessed = (B8 * D * x.dtype.itemsize
                      + B8 * LANES * jnp.dtype(x.dtype).itemsize
                      + wpack.size * wpack.dtype.itemsize
                      + bpack.size * bpack.dtype.itemsize)
    cost = pl.CostEstimate(flops=int(flops), transcendentals=0,
                           bytes_accessed=int(bytes_accessed))

    out = pl.pallas_call(
        deep_mlp_kernel,
        out_shape=jax.ShapeDtypeStruct((B8, LANES), x.dtype),
        grid_spec=pltpu.PrefetchScalarGridSpec(
            num_scalar_prefetch=0,
            grid=(n_blk,),
            in_specs=[x_spec, wpack_spec, bpack_spec],
            out_specs=out_spec,
        ),
        compiler_params=pltpu.CompilerParams(
            dimension_semantics=("parallel",),     # shards batch blocks across TCs
            vmem_limit_bytes=VMEM_LIMIT_BYTES,
        ),
        cost_estimate=cost,
    )(x_in, wpack, bpack)
    return out[:B, :LAYER_DIMS[-1]]


def reference_mlp(x, weights, biases):
    h = x
    for li, (w, b) in enumerate(zip(weights, biases)):
        h = h @ w.T + b
        if li != NUM_LAYERS - 1:
            h = jnp.maximum(h, 0.0)
    return h


if __name__ == "__main__":
    key = jax.random.PRNGKey(0)
    keys = jax.random.split(key, 1 + 2 * NUM_LAYERS)

    B = 8
    x = jax.random.normal(keys[0], (B, LAYER_DIMS[0]), dtype=jnp.float32)

    # Deterministic PyTorch-style init: uniform(-1/sqrt(fan_in), +1/sqrt(fan_in)).
    weights, biases = [], []
    for li in range(NUM_LAYERS):
        d_in, d_out = LAYER_DIMS[li], LAYER_DIMS[li + 1]
        bound = 1.0 / float(d_in) ** 0.5
        w = jax.random.uniform(keys[1 + 2 * li], (d_out, d_in),
                               minval=-bound, maxval=bound, dtype=jnp.float32)
        b = jax.random.uniform(keys[2 + 2 * li], (d_out,),
                               minval=-bound, maxval=bound, dtype=jnp.float32)
        weights.append(w)
        biases.append(b)

    out = deep_mlp(x, weights, biases)
    out = jax.block_until_ready(out)

    ref = reference_mlp(x, weights, biases)
    assert out.shape == (B, LAYER_DIMS[-1]), out.shape
    assert jnp.allclose(out, ref, atol=1e-5, rtol=1e-5), (out, ref)

    print("KERNEL_OK")
</pallas_src>

<mosaic_0001>
module attributes {stable_mosaic.version = 11 : i64} {
  func.func @deep_mlp_kernel(%arg0: i32, %arg1: memref<8x784xf32, #tpu.memory_space<vmem>>, %arg2: memref<1424x128xf32, #tpu.memory_space<vmem>>, %arg3: memref<8x128xf32, #tpu.memory_space<vmem>>, %arg4: memref<8x128xf32, #tpu.memory_space<vmem>>) attributes {dimension_semantics = [#tpu.dimension_semantics<parallel>], iteration_bounds = array<i64: 1>, scalar_prefetch = 0 : i64, scratch_operands = 0 : i64, tpu.core_type = #tpu.core_type<tc>, window_params = [{transform_indices = @transform_0, window_bounds = array<i64: 8, 784>}, {pipeline_mode = #tpu.pipeline_mode<synchronous>, transform_indices = @transform_1, window_bounds = array<i64: 1424, 128>}, {pipeline_mode = #tpu.pipeline_mode<synchronous>, transform_indices = @transform_2, window_bounds = array<i64: 8, 128>}, {transform_indices = @transform_3, window_bounds = array<i64: 8, 128>}]} {
    %c0 = arith.constant 0 : index
    %c0_0 = arith.constant 0 : index
    %0 = vector.load %arg1[%c0, %c0_0] : memref<8x784xf32, #tpu.memory_space<vmem>>, vector<8x784xf32>
    %c0_1 = arith.constant 0 : index
    %c0_2 = arith.constant 0 : index
    %1 = vector.load %arg2[%c0_1, %c0_2] : memref<1424x128xf32, #tpu.memory_space<vmem>>, vector<784x128xf32>
    %c0_3 = arith.constant 0 : index
    %c0_4 = arith.constant 0 : index
    %2 = vector.load %arg3[%c0_3, %c0_4] : memref<8x128xf32, #tpu.memory_space<vmem>>, vector<1x128xf32>
    %cst = arith.constant dense<0.000000e+00> : vector<8x128xf32>
    %3 = tpu.matmul %0, %1, %cst {dimension_numbers = #tpu.dot_dimension_numbers<[1], [0], [0], [1], [0, 0, 1, 1], [], []>} : vector<8x784xf32>, vector<784x128xf32>, vector<8x128xf32> -> vector<8x128xf32>
    %4 = vector.broadcast %2 : vector<1x128xf32> to vector<8x128xf32>
    %5 = arith.addf %3, %4 : vector<8x128xf32>
    %cst_5 = arith.constant 0.000000e+00 : f32
    %6 = vector.broadcast %cst_5 : f32 to vector<8x128xf32>
    %7 = arith.maximumf %5, %6 : vector<8x128xf32>
    %c784 = arith.constant 784 : index
    %c0_6 = arith.constant 0 : index
    %8 = vector.load %arg2[%c784, %c0_6] : memref<1424x128xf32, #tpu.memory_space<vmem>>, vector<128x128xf32>
    %c1 = arith.constant 1 : index
    %c0_7 = arith.constant 0 : index
    %9 = vector.load %arg3[%c1, %c0_7] : memref<8x128xf32, #tpu.memory_space<vmem>>, vector<1x128xf32>
    %cst_8 = arith.constant dense<0.000000e+00> : vector<8x128xf32>
    %10 = tpu.matmul %7, %8, %cst_8 {dimension_numbers = #tpu.dot_dimension_numbers<[1], [0], [0], [1], [0, 0, 1, 1], [], []>} : vector<8x128xf32>, vector<128x128xf32>, vector<8x128xf32> -> vector<8x128xf32>
    %11 = vector.broadcast %9 : vector<1x128xf32> to vector<8x128xf32>
    %12 = arith.addf %10, %11 : vector<8x128xf32>
    %cst_9 = arith.constant 0.000000e+00 : f32
    %13 = vector.broadcast %cst_9 : f32 to vector<8x128xf32>
    %14 = arith.maximumf %12, %13 : vector<8x128xf32>
    %c912 = arith.constant 912 : index
    %c0_10 = arith.constant 0 : index
    %15 = vector.load %arg2[%c912, %c0_10] : memref<1424x128xf32, #tpu.memory_space<vmem>>, vector<128x128xf32>
    %c2 = arith.constant 2 : index
    %c0_11 = arith.constant 0 : index
    %16 = vector.load %arg3[%c2, %c0_11] : memref<8x128xf32, #tpu.memory_space<vmem>>, vector<1x128xf32>
    %cst_12 = arith.constant dense<0.000000e+00> : vector<8x128xf32>
    %17 = tpu.matmul %14, %15, %cst_12 {dimension_numbers = #tpu.dot_dimension_numbers<[1], [0], [0], [1], [0, 0, 1, 1], [], []>} : vector<8x128xf32>, vector<128x128xf32>, vector<8x128xf32> -> vector<8x128xf32>
    %18 = vector.broadcast %16 : vector<1x128xf32> to vector<8x128xf32>
    %19 = arith.addf %17, %18 : vector<8x128xf32>
    %cst_13 = arith.constant 0.000000e+00 : f32
    %20 = vector.broadcast %cst_13 : f32 to vector<8x128xf32>
    %21 = arith.maximumf %19, %20 : vector<8x128xf32>
    %c1040 = arith.constant 1040 : index
    %c0_14 = arith.constant 0 : index
    %22 = vector.load %arg2[%c1040, %c0_14] : memref<1424x128xf32, #tpu.memory_space<vmem>>, vector<128x128xf32>
    %c3 = arith.constant 3 : index
    %c0_15 = arith.constant 0 : index
    %23 = vector.load %arg3[%c3, %c0_15] : memref<8x128xf32, #tpu.memory_space<vmem>>, vector<1x128xf32>
    %cst_16 = arith.constant dense<0.000000e+00> : vector<8x128xf32>
    %24 = tpu.matmul %21, %22, %cst_16 {dimension_numbers = #tpu.dot_dimension_numbers<[1], [0], [0], [1], [0, 0, 1, 1], [], []>} : vector<8x128xf32>, vector<128x128xf32>, vector<8x128xf32> -> vector<8x128xf32>
    %25 = vector.broadcast %23 : vector<1x128xf32> to vector<8x128xf32>
    %26 = arith.addf %24, %25 : vector<8x128xf32>
    %cst_17 = arith.constant 0.000000e+00 : f32
    %27 = vector.broadcast %cst_17 : f32 to vector<8x128xf32>
    %28 = arith.maximumf %26, %27 : vector<8x128xf32>
    %c1168 = arith.constant 1168 : index
    %c0_18 = arith.constant 0 : index
    %29 = vector.load %arg2[%c1168, %c0_18] : memref<1424x128xf32, #tpu.memory_space<vmem>>, vector<128x128xf32>
    %c4 = arith.constant 4 : index
    %c0_19 = arith.constant 0 : index
    %30 = vector.load %arg3[%c4, %c0_19] : memref<8x128xf32, #tpu.memory_space<vmem>>, vector<1x128xf32>
    %cst_20 = arith.constant dense<0.000000e+00> : vector<8x128xf32>
    %31 = tpu.matmul %28, %29, %cst_20 {dimension_numbers = #tpu.dot_dimension_numbers<[1], [0], [0], [1], [0, 0, 1, 1], [], []>} : vector<8x128xf32>, vector<128x128xf32>, vector<8x128xf32> -> vector<8x128xf32>
    %32 = vector.broadcast %30 : vector<1x128xf32> to vector<8x128xf32>
    %33 = arith.addf %31, %32 : vector<8x128xf32>
    %cst_21 = arith.constant 0.000000e+00 : f32
    %34 = vector.broadcast %cst_21 : f32 to vector<8x128xf32>
    %35 = arith.maximumf %33, %34 : vector<8x128xf32>
    %c1296 = arith.constant 1296 : index
    %c0_22 = arith.constant 0 : index
    %36 = vector.load %arg2[%c1296, %c0_22] : memref<1424x128xf32, #tpu.memory_space<vmem>>, vector<128x128xf32>
    %c5 = arith.constant 5 : index
    %c0_23 = arith.constant 0 : index
    %37 = vector.load %arg3[%c5, %c0_23] : memref<8x128xf32, #tpu.memory_space<vmem>>, vector<1x128xf32>
    %cst_24 = arith.constant dense<0.000000e+00> : vector<8x128xf32>
    %38 = tpu.matmul %35, %36, %cst_24 {dimension_numbers = #tpu.dot_dimension_numbers<[1], [0], [0], [1], [0, 0, 1, 1], [], []>} : vector<8x128xf32>, vector<128x128xf32>, vector<8x128xf32> -> vector<8x128xf32>
    %39 = vector.broadcast %37 : vector<1x128xf32> to vector<8x128xf32>
    %40 = arith.addf %38, %39 : vector<8x128xf32>
    %c0_25 = arith.constant 0 : index
    %c0_26 = arith.constant 0 : index
    %41 = vector.load %arg4[%c0_25, %c0_26] : memref<8x128xf32, #tpu.memory_space<vmem>>, vector<8x128xf32>
    tpu.vector_store %arg4[%c0_25, %c0_26], %40 {strides = array<i32>} : memref<8x128xf32, #tpu.memory_space<vmem>>, vector<8x128xf32>,
    return
  }
  func.func @transform_0(%arg0: i32) -> (i32, i32) {
    %c0_i32 = arith.constant 0 : i32
    %c0_i32_0 = arith.constant 0 : i32
    return %arg0, %c0_i32 : i32, i32
  }
  func.func @transform_1(%arg0: i32) -> (i32, i32) {
    %c0_i32 = arith.constant 0 : i32
    %c0_i32_0 = arith.constant 0 : i32
    %c0_i32_1 = arith.constant 0 : i32
    return %c0_i32, %c0_i32_0 : i32, i32
  }
  func.func @transform_2(%arg0: i32) -> (i32, i32) {
    %c0_i32 = arith.constant 0 : i32
    %c0_i32_0 = arith.constant 0 : i32
    %c0_i32_1 = arith.constant 0 : i32
    return %c0_i32, %c0_i32_0 : i32, i32
  }
  func.func @transform_3(%arg0: i32) -> (i32, i32) {
    %c0_i32 = arith.constant 0 : i32
    %c0_i32_0 = arith.constant 0 : i32
    return %arg0, %c0_i32 : i32, i32
  }
}

</mosaic_0001>

<bundles_post_ra>
// kernel: tpu_custom_call.1
= control target key start
LH: loop header
LB: loop body
LE: loop exit
PB: predicated region body
PF: predicated region fallthrough
CT: control target
= control target key end

     0   :  { %8 = vsyncpa [#allocation3], 0  ;;  %s1757_s0 = inlined_call_operand.hbm [shape: f32[8,784], index: 0, kind: input, shape index: {}]   ;;  %s1758_s1 = inlined_call_operand.hbm [shape: f32[1424,128], index: 1, kind: input, shape index: {}]   ;;  %s1759_s2 = inlined_call_operand.hbm [shape: f32[8,128], index: 2, kind: input, shape index: {}]   ;;  %s1760_s3 = inlined_call_operand.hbm [shape: f32[8,128], index: 3, kind: output, shape index: {}]  }
   0x1   :  { %9 = vsyncpa [#allocation6], 0 }
   0x2   :  { %10 = vsyncpa [#allocation4], 0  ;;  %s1627_s12 = smov [#allocation5]   ;;  %s1533_s16 = scalar_lea.hbm %s1758_s1, 22784 }
   0x3   :  { %s26_s13 = sshll.u32 %s1627_s12, 4  ;;  %p1534_p0 = scmp.ne.s32.totalorder %s1758_s1, %s1533_s16  ;;  %s27_s13 = int_to_ptr.vmem [resolvable:$true] %s26_s13 }
   0x4   :  { %p1537_p1 = scmp.lt.u32.totalorder %s1533_s16, %s1758_s1 }
   0x6   :  { %p1539_p2 = pnand %p1537_p1, %p1534_p0 }
   0x8   :  { %1542 = shalt.err (!%p1539_p2)
}
   0x9   :  { %s1543_s21 = scalar_lea.vmem %s27_s13, 22784  ;;  %p1548_p4 = scmp.lt.s32.totalorder %s27_s13, %s27_s13 }
   0xa   :  { %p1544_p3 = scmp.ne.s32.totalorder %s27_s13, %s1543_s21  ;;  %p1549_p5 = scmp.lt.s32.totalorder %s1543_s21, %s1543_s21 }
   0xc   :  { %p1550_p6 = por %p1549_p5, %p1548_p4 }
   0xe   :  { %p1551_p7 = pnand %p1550_p6, %p1544_p3 }
  0x10   :  { %1554 = shalt.err (!%p1551_p7)
}
  0x11   :  { %s1628_s22 = smov 128   ;;  %s1629_s23 = smov 8  }
  0x12   :  { %32 = dma.hbm_to_vmem [thread:$0]  %s1758_s1, 22784, %s27_s13, [#allocation6], %s1628_s22, %s1628_s22, %s1629_s23  }
  0x13   :  { %s1630_s26 = smov [#allocation2]   ;;  %s1631_s28 = smov [#allocation7]  }
  0x14   :  { %s17_s27 = sshll.u32 %s1630_s26, 4  ;;  %s39_s29 = sshll.u32 %s1631_s28, 4  ;;  %s18_s27 = int_to_ptr.vmem [resolvable:$true] %s17_s27  ;;  %s40_s29 = int_to_ptr.vmem [resolvable:$true] %s39_s29 }
  0x15   :  { %s1555_s5 = scalar_lea.hbm %s1757_s0, 896 }
  0x16   :  { %p1556_p8 = scmp.ne.s32.totalorder %s1757_s0, %s1555_s5  ;;  %p1559_p9 = scmp.lt.u32.totalorder %s1555_s5, %s1757_s0 }
  0x18   :  { %p1561_p10 = pnand %p1559_p9, %p1556_p8 }
  0x1a   :  { %1564 = shalt.err (!%p1561_p10)
}
  0x1b   :  { %s1565_s1 = scalar_lea.vmem %s18_s27, 896  ;;  %p1570_p12 = scmp.lt.s32.totalorder %s18_s27, %s18_s27 }
  0x1c   :  { %p1566_p11 = scmp.ne.s32.totalorder %s18_s27, %s1565_s1  ;;  %p1571_p13 = scmp.lt.s32.totalorder %s1565_s1, %s1565_s1 }
  0x1e   :  { %p1572_p0 = por %p1571_p13, %p1570_p12 }
  0x20   :  { %p1573_p1 = pnand %p1572_p0, %p1566_p11 }
  0x22   :  { %1576 = shalt.err (!%p1573_p1)
}
  0x23   :  { %20 = dma.hbm_to_vmem [thread:$0]  %s1757_s0, 896, %s18_s27, [#allocation3]  }
  0x24   :  { %s1577_s14 = scalar_lea.hbm %s1759_s2, 128 }
  0x25   :  { %p1578_p2 = scmp.ne.s32.totalorder %s1759_s2, %s1577_s14  ;;  %p1581_p3 = scmp.lt.u32.totalorder %s1577_s14, %s1759_s2 }
  0x27   :  { %p1583_p4 = pnand %p1581_p3, %p1578_p2 }
  0x29   :  { %1586 = shalt.err (!%p1583_p4)
}
  0x2a   :  { %s1587_s19 = scalar_lea.vmem %s40_s29, 128  ;;  %p1592_p6 = scmp.lt.s32.totalorder %s40_s29, %s40_s29 }
  0x2b   :  { %p1588_p5 = scmp.ne.s32.totalorder %s40_s29, %s1587_s19  ;;  %p1593_p7 = scmp.lt.s32.totalorder %s1587_s19, %s1587_s19 }
  0x2d   :  { %p1594_p8 = por %p1593_p7, %p1592_p6 }
  0x2f   :  { %p1595_p9 = pnand %p1594_p8, %p1588_p5 }
  0x31   :  { %1598 = shalt.err (!%p1595_p9)
}
  0x32   :  { %42 = dma.hbm_to_vmem [thread:$0]  %s1759_s2, 128, %s40_s29, [#allocation6]  }
  0x33   :  { %1621 = dma.done.wait [#allocation3], 896  }
  0x34   :  { %1622 = vsyncadd [#allocation3], 4294966400 }
  0x35   :  { %1623 = dma.done.wait [#allocation6], 22912  }
  0x36   :  { %1624 = vsyncadd [#allocation6], 4294944384  ;;  %v75_v0 = vld [vmem:[#allocation5 + $0x80] sm:$0xff]  ;;  %v76_v1 = vld [vmem:[#allocation5 + $0x88] sm:$0xff]  ;;  %vm1633_vm0 = vmmov 0   ;;  %vm162_vm1 = vcmask 130048  }
  0x37   :  { %v59_v2 = vld [vmem:[#allocation5] sm:$0xff]  ;;  %v1305_v3 = vpack.c.bf16 %v76_v1, %v75_v0  ;;  %v60_v4 = vld [vmem:[#allocation5 + $0x8] sm:$0xff]  ;;  %v77_v11 = vld [vmem:[#allocation5 + $0x90] sm:$0xff]  ;;  %s1635_s2 = smov [#allocation8]  }
  0x38   :  { %v107_v5 = vld [vmem:[#allocation5 + $0x180] sm:$0xff]  ;;  %v108_v6 = vld [vmem:[#allocation5 + $0x188] sm:$0xff]  ;;  %v1307_v7 = vpack.c.bf16 %v60_v4, %v59_v2  ;;  %v78_v13 = vld [vmem:[#allocation5 + $0x98] sm:$0xff]  ;;  %s913_s21 = sshll.u32 %s1635_s2, 4  ;;  %s914_s21 = int_to_ptr.vmem [resolvable:$true] %s913_s21 }
  0x39   :  { %v1337_v8 = vpack.c.bf16 %v108_v6, %v107_v5  ;;  %v91_v9 = vld [vmem:[#allocation5 + $0x100] sm:$0xff]  ;;  %v92_v10 = vld [vmem:[#allocation5 + $0x108] sm:$0xff]  ;;  %1306 = vmatprep.subr.bf16.mxu0 %v1305_v3  ;;  %v61_v14 = vld [vmem:[#allocation5 + $0x10] sm:$0xff]  ;;  %v1309_v16 = vpack.c.bf16 %v78_v13, %v77_v11  ;;  %s1599_s22 = scalar_lea.vmem %s914_s21, 128  ;;  %p1604_p11 = scmp.lt.s32.totalorder %s914_s21, %s914_s21 }
  0x3a   :  { %v1339_v12 = vpack.c.bf16 %v92_v10, %v91_v9  ;;  %v62_v15 = vld [vmem:[#allocation5 + $0x18] sm:$0xff]  ;;  %1308 = vmatpush3.bf16.msra.mxu0 %v1307_v7  ;;  %v109_v18 = vld [vmem:[#allocation5 + $0x190] sm:$0xff]  ;;  %v79_v23 = vld [vmem:[#allocation5 + $0xa0] sm:$0xff]  ;;  %p1600_p10 = scmp.ne.s32.totalorder %s914_s21, %s1599_s22  ;;  %p1605_p12 = scmp.lt.s32.totalorder %s1599_s22, %s1599_s22 }
  0x3b   :  { %1338 = vmatprep.subr.bf16.mxu1 %v1337_v8  ;;  %v1311_v17 = vpack.c.bf16 %v62_v15, %v61_v14  ;;  %v110_v19 = vld [vmem:[#allocation5 + $0x198] sm:$0xff]  ;;  %v93_v20 = vld [vmem:[#allocation5 + $0x110] sm:$0xff]  ;;  %v80_v24 = vld [vmem:[#allocation5 + $0xa8] sm:$0xff]  ;;  %1310 = vmatprep.subr.bf16.mxu0 %v1309_v16 }
  0x3c   :  { %1340 = vmatpush3.bf16.msra.mxu1 %v1339_v12  ;;  %v1341_v21 = vpack.c.bf16 %v110_v19, %v109_v18  ;;  %v94_v22 = vld [vmem:[#allocation5 + $0x118] sm:$0xff]  ;;  %v1313_v26 = vpack.c.bf16 %v80_v24, %v79_v23  ;;  %v63_v27 = vld [vmem:[#allocation5 + $0x20] sm:$0xff]  ;;  %v64_v28 = vld [vmem:[#allocation5 + $0x28] sm:$0xff]  ;;  %p1606_p13 = por %p1605_p12, %p1604_p11 }
  0x3d   :  { %v1343_v25 = vpack.c.bf16 %v94_v22, %v93_v20  ;;  %v111_v29 = vld [vmem:[#allocation5 + $0x1a0] sm:$0xff]  ;;  %v112_v30 = vld [vmem:[#allocation5 + $0x1a8] sm:$0xff]  ;;  %v1315_v33 = vpack.c.bf16 %v64_v28, %v63_v27  ;;  %v81_v35 = vld [vmem:[#allocation5 + $0xb0] sm:$0xff] }
  0x3e   :  { %1342 = vmatprep.subr.bf16.mxu1 %v1341_v21  ;;  %v95_v31 = vld [vmem:[#allocation5 + $0x120] sm:$0xff]  ;;  %v96_v32 = vld [vmem:[#allocation5 + $0x128] sm:$0xff]  ;;  %1312 = vmatpush3.bf16.msra.mxu0 %v1311_v17  ;;  %v1345_v34 = vpack.c.bf16 %v112_v30, %v111_v29  ;;  %v82_v36 = vld [vmem:[#allocation5 + $0xb8] sm:$0xff]  ;;  %p1607_p0 = pnand %p1606_p13, %p1600_p10 }
  0x3f   :  { %v65_v37 = vld [vmem:[#allocation5 + $0x30] sm:$0xff]  ;;  %1314 = vmatprep.subr.bf16.mxu0 %v1313_v26  ;;  %v1347_v38 = vpack.c.bf16 %v96_v32, %v95_v31  ;;  %v1317_v39 = vpack.c.bf16 %v82_v36, %v81_v35  ;;  %v66_v40 = vld [vmem:[#allocation5 + $0x38] sm:$0xff]  ;;  %v83_v46 = vld [vmem:[#allocation5 + $0xc0] sm:$0xff] }
  0x40   :  { %1344 = vmatpush3.bf16.msra.mxu1 %v1343_v25  ;;  %v113_v41 = vld [vmem:[#allocation5 + $0x1b0] sm:$0xff]  ;;  %v114_v42 = vld [vmem:[#allocation5 + $0x1b8] sm:$0xff]  ;;  %v84_v47 = vld [vmem:[#allocation5 + $0xc8] sm:$0xff]  ;;  %v1319_v48 = vpack.c.bf16 %v66_v40, %v65_v37 }
  0x41   :  { %1346 = vmatprep.subr.bf16.mxu1 %v1345_v34  ;;  %v1349_v43 = vpack.c.bf16 %v114_v42, %v113_v41  ;;  %v97_v44 = vld [vmem:[#allocation5 + $0x130] sm:$0xff]  ;;  %v98_v45 = vld [vmem:[#allocation5 + $0x138] sm:$0xff]  ;;  %v115_v49 = vld [vmem:[#allocation5 + $0x1c0] sm:$0xff]  ;;  %v1321_v52 = vpack.c.bf16 %v84_v47, %v83_v46 }
  0x42   :  { %1316 = vmatpush3.bf16.msra.mxu0 %v1315_v33  ;;  %v116_v50 = vld [vmem:[#allocation5 + $0x1c8] sm:$0xff]  ;;  %v1351_v51 = vpack.c.bf16 %v98_v45, %v97_v44  ;;  %v67_v53 = vld [vmem:[#allocation5 + $0x40] sm:$0xff]  ;;  %v85_v58 = vld [vmem:[#allocation5 + $0xd0] sm:$0xff] }
  0x43   :  { %1318 = vmatprep.subr.bf16.mxu0 %v1317_v39  ;;  %v68_v54 = vld [vmem:[#allocation5 + $0x48] sm:$0xff]  ;;  %v99_v55 = vld [vmem:[#allocation5 + $0x140] sm:$0xff]  ;;  %v1353_v56 = vpack.c.bf16 %v116_v50, %v115_v49  ;;  %v86_v59 = vld [vmem:[#allocation5 + $0xd8] sm:$0xff]  ;;  %v1632_v50 = vmov 0.0|0.0  }
  0x44   :  { %1348 = vmatpush3.bf16.msra.mxu1 %v1347_v38  ;;  %v100_v57 = vld [vmem:[#allocation5 + $0x148] sm:$0xff]  ;;  %v117_v60 = vld [vmem:[#allocation5 + $0x1d0] sm:$0xff]  ;;  %v118_v61 = vld [vmem:[#allocation5 + $0x1d8] sm:$0xff]  ;;  %v1323_v62 = vpack.c.bf16 %v68_v54, %v67_v53  ;;  %v1325_v0 = vpack.c.bf16 %v86_v59, %v85_v58 }
  0x45   :  { %1350 = vmatprep.subr.bf16.mxu1 %v1349_v43  ;;  %v1355_v63 = vpack.c.bf16 %v100_v57, %v99_v55  ;;  %v69_v1 = vld [vmem:[#allocation5 + $0x50] sm:$0xff]  ;;  %v70_v2 = vld [vmem:[#allocation5 + $0x58] sm:$0xff]  ;;  %v1357_v4 = vpack.c.bf16 %v118_v61, %v117_v60  ;;  %v87_v6 = vld [vmem:[#allocation5 + $0xe0] sm:$0xff]  ;;  %v1634_v60 = vmov 0.0  }
  0x46   :  { %1320 = vmatpush3.bf16.msra.mxu0 %v1319_v48  ;;  %v101_v3 = vld [vmem:[#allocation5 + $0x150] sm:$0xff]  ;;  %v102_v5 = vld [vmem:[#allocation5 + $0x158] sm:$0xff]  ;;  %v88_v7 = vld [vmem:[#allocation5 + $0xe8] sm:$0xff]  ;;  %v1327_v10 = vpack.c.bf16 %v70_v2, %v69_v1 }
  0x47   :  { %1322 = vmatprep.subr.bf16.mxu0 %v1321_v52  ;;  %v119_v8 = vld [vmem:[#allocation5 + $0x1e0] sm:$0xff]  ;;  %v120_v9 = vld [vmem:[#allocation5 + $0x1e8] sm:$0xff]  ;;  %v53_v12 = vld [vmem:[#allocation2 + $0x8] sm:$0xff]  ;;  %v1359_v13 = vpack.c.bf16 %v102_v5, %v101_v3  ;;  %v1329_v14 = vpack.c.bf16 %v88_v7, %v87_v6 }
  0x48   :  { %1352 = vmatpush3.bf16.msra.mxu1 %v1351_v51  ;;  %v71_v11 = vld [vmem:[#allocation5 + $0x60] sm:$0xff]  ;;  %v72_v15 = vld [vmem:[#allocation5 + $0x68] sm:$0xff]  ;;  %v1361_v18 = vpack.c.bf16 %v120_v9, %v119_v8  ;;  %v89_v19 = vld [vmem:[#allocation5 + $0xf0] sm:$0xff]  ;;  %230 = vmatprep.mubr.f32.mxu0 %v53_v12 }
  0x49   :  { %1354 = vmatprep.subr.bf16.mxu1 %v1353_v56  ;;  %v103_v16 = vld [vmem:[#allocation5 + $0x160] sm:$0xff]  ;;  %v104_v17 = vld [vmem:[#allocation5 + $0x168] sm:$0xff]  ;;  %v90_v20 = vld [vmem:[#allocation5 + $0xf8] sm:$0xff]  ;;  %v1331_v24 = vpack.c.bf16 %v72_v15, %v71_v11 }
  0x4a   :  { %1324 = vmatpush3.bf16.msra.mxu0 %v1323_v62  ;;  %v55_v21 = vld [vmem:[#allocation2 + $0x18] sm:$0xff]  ;;  %v121_v22 = vld [vmem:[#allocation5 + $0x1f0] sm:$0xff]  ;;  %v122_v23 = vld [vmem:[#allocation5 + $0x1f8] sm:$0xff]  ;;  %v1363_v25 = vpack.c.bf16 %v104_v17, %v103_v16  ;;  %v1333_v26 = vpack.c.bf16 %v90_v20, %v89_v19 }
  0x4b   :  { %1326 = vmatprep.subr.bf16.mxu0 %v1325_v0  ;;  %300 = vmatprep.mubr.f32.mxu1 %v55_v21  ;;  %v73_v27 = vld [vmem:[#allocation5 + $0x70] sm:$0xff]  ;;  %v74_v28 = vld [vmem:[#allocation5 + $0x78] sm:$0xff]  ;;  %v1365_v30 = vpack.c.bf16 %v122_v23, %v121_v22  ;;  %v139_v32 = vld [vmem:[#allocation5 + $0x280] sm:$0xff] }
  0x4c   :  { %1356 = vmatpush3.bf16.msra.mxu1 %v1355_v63  ;;  %v105_v29 = vld [vmem:[#allocation5 + $0x170] sm:$0xff]  ;;  %v106_v31 = vld [vmem:[#allocation5 + $0x178] sm:$0xff]  ;;  %v140_v33 = vld [vmem:[#allocation5 + $0x288] sm:$0xff]  ;;  %v1335_v34 = vpack.c.bf16 %v74_v28, %v73_v27 }
  0x4d   :  { %1358 = vmatprep.subr.bf16.mxu1 %v1357_v4  ;;  %v1367_v35 = vpack.c.bf16 %v106_v31, %v105_v29  ;;  %v1369_v36 = vpack.c.bf16 %v140_v33, %v139_v32  ;;  %v123_v37 = vld [vmem:[#allocation5 + $0x200] sm:$0xff]  ;;  %v124_v38 = vld [vmem:[#allocation5 + $0x208] sm:$0xff]  ;;  %v141_v39 = vld [vmem:[#allocation5 + $0x290] sm:$0xff] }
  0x4e   :  { %1328 = vmatpush3.bf16.msra.mxu0 %v1327_v10  ;;  %v142_v40 = vld [vmem:[#allocation5 + $0x298] sm:$0xff]  ;;  %v52_v41 = vld [vmem:[#allocation2] sm:$0xff]  ;;  %v1371_v42 = vpack.c.bf16 %v124_v38, %v123_v37  ;;  %v125_v44 = vld [vmem:[#allocation5 + $0x210] sm:$0xff] }
  0x4f   :  { %1330 = vmatprep.subr.bf16.mxu0 %v1329_v14  ;;  %v54_v43 = vld [vmem:[#allocation2 + $0x10] sm:$0xff]  ;;  %v1373_v45 = vpack.c.bf16 %v142_v40, %v141_v39  ;;  %v143_v47 = vld [vmem:[#allocation5 + $0x2a0] sm:$0xff]  ;;  %v144_v48 = vld [vmem:[#allocation5 + $0x2a8] sm:$0xff] }
  0x50   :  { %1360 = vmatpush3.bf16.msra.mxu1 %v1359_v13  ;;  %v126_v46 = vld [vmem:[#allocation5 + $0x218] sm:$0xff]  ;;  %v57_v49 = vld [vmem:[#allocation2 + $0x28] sm:$0xff]  ;;  %v155_v51 = vld [vmem:[#allocation5 + $0x300] sm:$0xff]  ;;  %v1377_v55 = vpack.c.bf16 %v144_v48, %v143_v47 }
  0x51   :  { %1362 = vmatprep.subr.bf16.mxu1 %v1361_v18  ;;  %v156_v52 = vld [vmem:[#allocation5 + $0x308] sm:$0xff]  ;;  %v1375_v54 = vpack.c.bf16 %v126_v46, %v125_v44  ;;  %v127_v56 = vld [vmem:[#allocation5 + $0x220] sm:$0xff]  ;;  %v145_v58 = vld [vmem:[#allocation5 + $0x2b0] sm:$0xff] }
  0x52   :  { %1332 = vmatpush3.bf16.msra.mxu0 %v1331_v24  ;;  %v1402_v53 = vpack.c.bf16 %v156_v52, %v155_v51  ;;  %v128_v57 = vld [vmem:[#allocation5 + $0x228] sm:$0xff]  ;;  %v146_v59 = vld [vmem:[#allocation5 + $0x2b8] sm:$0xff]  ;;  %v129_v0 = vld [vmem:[#allocation5 + $0x230] sm:$0xff] }
  0x53   :  { %1334 = vmatprep.subr.bf16.mxu0 %v1333_v26  ;;  %v58_v61 = vld [vmem:[#allocation2 + $0x30] sm:$0xff]  ;;  %v1379_v62 = vpack.c.bf16 %v128_v57, %v127_v56  ;;  %v1381_v63 = vpack.c.bf16 %v146_v59, %v145_v58  ;;  %v147_v2 = vld [vmem:[#allocation5 + $0x2c0] sm:$0xff]  ;;  %v148_v3 = vld [vmem:[#allocation5 + $0x2c8] sm:$0xff] }
  0x54   :  { %1364 = vmatpush3.bf16.msra.mxu1 %v1363_v25  ;;  %v130_v1 = vld [vmem:[#allocation5 + $0x238] sm:$0xff]  ;;  %v1385_v5 = vpack.c.bf16 %v148_v3, %v147_v2  ;;  %v131_v6 = vld [vmem:[#allocation5 + $0x240] sm:$0xff]  ;;  %v132_v7 = vld [vmem:[#allocation5 + $0x248] sm:$0xff] }
  0x55   :  { %1366 = vmatprep.subr.bf16.mxu1 %v1365_v30  ;;  %v1383_v4 = vpack.c.bf16 %v130_v1, %v129_v0  ;;  %v149_v8 = vld [vmem:[#allocation5 + $0x2d0] sm:$0xff]  ;;  %v150_v9 = vld [vmem:[#allocation5 + $0x2d8] sm:$0xff]  ;;  %v1387_v10 = vpack.c.bf16 %v132_v7, %v131_v6  ;;  %v151_v14 = vld [vmem:[#allocation5 + $0x2e0] sm:$0xff] }
  0x56   :  { %1336 = vmatpush3.bf16.msra.mxu0 %v1335_v34  ;;  %v1389_v11 = vpack.c.bf16 %v150_v9, %v149_v8  ;;  %v133_v12 = vld [vmem:[#allocation5 + $0x250] sm:$0xff]  ;;  %v134_v13 = vld [vmem:[#allocation5 + $0x258] sm:$0xff]  ;;  %v152_v15 = vld [vmem:[#allocation5 + $0x2e8] sm:$0xff] }
  0x57   :  { %1370 = vmatprep.subr.bf16.mxu0 %v1369_v36  ;;  %v1391_v16 = vpack.c.bf16 %v134_v13, %v133_v12  ;;  %v1393_v17 = vpack.c.bf16 %v152_v15, %v151_v14  ;;  %v135_v18 = vld [vmem:[#allocation5 + $0x260] sm:$0xff]  ;;  %v136_v19 = vld [vmem:[#allocation5 + $0x268] sm:$0xff]  ;;  %v153_v20 = vld [vmem:[#allocation5 + $0x2f0] sm:$0xff] }
  0x58   :  { %1368 = vmatpush3.bf16.msra.mxu1 %v1367_v35  ;;  %v154_v21 = vld [vmem:[#allocation5 + $0x2f8] sm:$0xff]  ;;  %v1395_v22 = vpack.c.bf16 %v136_v19, %v135_v18  ;;  %v137_v24 = vld [vmem:[#allocation5 + $0x270] sm:$0xff]  ;;  %v56_v27 = vld [vmem:[#allocation2 + $0x20] sm:$0xff] }
  0x59   :  { %1401 = vmatprep.subr.bf16.mxu1 %v1632_v50  ;;  %231 = vmatmul.mubr.f32.vlgmr.msra.gmra.mrb[0].mxu0 %v52_v41  ;;  %v1397_v23 = vpack.c.bf16 %v154_v21, %v153_v20  ;;  %v138_v25 = vld [vmem:[#allocation5 + $0x278] sm:$0xff]  ;;  %v447_v28 = vld [vmem:[#allocation5 + $0x310] sm:$0xff]  ;;  %v449_v30 = vld [vmem:[#allocation5 + $0x320] sm:$0xff] }
  0x5a   :  { %1372 = vmatpush3.bf16.msra.mxu0 %v1371_v42  ;;  %370 = vmatprep.mubr.f32.mxu0 %v57_v49  ;;  %v1399_v26 = vpack.c.bf16 %v138_v25, %v137_v24  ;;  %v448_v29 = vld [vmem:[#allocation5 + $0x318] sm:$0xff]  ;;  %v450_v32 = vld [vmem:[#allocation5 + $0x328] sm:$0xff]  ;;  %v451_v34 = vld [vmem:[#allocation5 + $0x330] sm:$0xff] }
  0x5b   :  { %301 = vmatmul.mubr.f32.vlgmr.msra.gmra.mrb[0].mxu1 %v54_v43  ;;  %1374 = vmatprep.subr.bf16.mxu0 %v1373_v45  ;;  %v1405_v31 = vpack.c.bf16 %v448_v29, %v447_v28  ;;  %v1408_v33 = vpack.c.bf16 %v450_v32, %v449_v30  ;;  %v452_v35 = vld [vmem:[#allocation5 + $0x338] sm:$0xff]  ;;  %v453_v37 = vld [vmem:[#allocation5 + $0x340] sm:$0xff]  ;;  %v454_v38 = vld [vmem:[#allocation5 + $0x348] sm:$0xff] }
  0x5c   :  { %1403 = vmatpush3.bf16.msra.mxu1 %v1402_v53  ;;  %1127 = vmatprep.mubr.msk.f32.mxu1 %vm1633_vm0, %v1634_v60  ;;  %v1411_v36 = vpack.c.bf16 %v452_v35, %v451_v34  ;;  %v1414_v39 = vpack.c.bf16 %v454_v38, %v453_v37  ;;  %v455_v40 = vld [vmem:[#allocation5 + $0x350] sm:$0xff]  ;;  %v456_v41 = vld [vmem:[#allocation5 + $0x358] sm:$0xff]  ;;  %v457_v43 = vld [vmem:[#allocation5 + $0x360] sm:$0xff] }
  0x5d   :  { %1404 = vmatprep.subr.bf16.mxu1 %v1632_v50  ;;  %v1417_v42 = vpack.c.bf16 %v456_v41, %v455_v40  ;;  %v458_v44 = vld [vmem:[#allocation5 + $0x368] sm:$0xff]  ;;  %v459_v46 = vld [vmem:[#allocation5 + $0x370] sm:$0xff]  ;;  %v460_v47 = vld [vmem:[#allocation5 + $0x378] sm:$0xff] }
  0x5e   :  { %1376 = vmatpush3.bf16.msra.mxu0 %v1375_v54  ;;  %v1420_v45 = vpack.c.bf16 %v458_v44, %v457_v43  ;;  %v1423_v48 = vpack.c.bf16 %v460_v47, %v459_v46  ;;  %v461_v49 = vld [vmem:[#allocation5 + $0x380] sm:$0xff]  ;;  %v462_v51 = vld [vmem:[#allocation5 + $0x388] sm:$0xff]  ;;  %v539_v53 = vld [vmem:[#allocation5 + $0x390] sm:$0xff] }
  0x5f   :  { %1378 = vmatprep.subr.bf16.mxu0 %v1377_v55  ;;  %1128 = vmatmul.mubr.msk.f32.vlgmr.msra.gmra.mrb[2].mxu1 %vm162_vm1, %v58_v61  ;;  %v1426_v52 = vpack.c.bf16 %v462_v51, %v461_v49  ;;  %v540_v54 = vld [vmem:[#allocation5 + $0x398] sm:$0xff]  ;;  %v541_v55 = vld [vmem:[#allocation5 + $0x3a0] sm:$0xff]  ;;  %v542_v57 = vld [vmem:[#allocation5 + $0x3a8] sm:$0xff] }
  0x60   :  { %1162 = vmatprep.mubr.msk.f32.mxu1 %vm1633_vm0, %v1634_v60  ;;  %1406 = vmatpush3.bf16.msra.mxu1 %v1405_v31  ;;  %v1429_v56 = vpack.c.bf16 %v540_v54, %v539_v53  ;;  %v1432_v58 = vpack.c.bf16 %v542_v57, %v541_v55  ;;  %v543_v59 = vld [vmem:[#allocation5 + $0x3b0] sm:$0xff]  ;;  %v544_v61 = vld [vmem:[#allocation5 + $0x3b8] sm:$0xff]  ;;  %v546_v0 = vld [vmem:[#allocation5 + $0x3c8] sm:$0xff] }
  0x61   :  { %1407 = vmatprep.subr.bf16.mxu1 %v1632_v50  ;;  %v547_v2 = vld [vmem:[#allocation5 + $0x3d0] sm:$0xff]  ;;  %v548_v3 = vld [vmem:[#allocation5 + $0x3d8] sm:$0xff]  ;;  %v550_v6 = vld [vmem:[#allocation5 + $0x3e8] sm:$0xff] }
  0x62   :  { %1380 = vmatpush3.bf16.msra.mxu0 %v1379_v62  ;;  %v1435_v62 = vpack.c.bf16 %v544_v61, %v543_v59  ;;  %v551_v8 = vld [vmem:[#allocation5 + $0x3f0] sm:$0xff]  ;;  %v552_v9 = vld [vmem:[#allocation5 + $0x3f8] sm:$0xff]  ;;  %v553_v28 = vld [vmem:[#allocation5 + $0x400] sm:$0xff] }
  0x63   :  { %1382 = vmatprep.subr.bf16.mxu0 %v1381_v63  ;;  %v545_v63 = vld [vmem:[#allocation5 + $0x3c0] sm:$0xff]  ;;  %v923_v12 = vld [vmem:[#allocation7] ss:$0 sm:$0xff]  ;;  %v554_v29 = vld [vmem:[#allocation5 + $0x408] sm:$0xff] }
  0x64   :  { %1409 = vmatpush3.bf16.msra.mxu1 %v1408_v33  ;;  %v1438_v1 = vpack.c.bf16 %v546_v0, %v545_v63  ;;  %v1450_v30 = vpack.c.bf16 %v554_v29, %v553_v28  ;;  %v631_v31 = vld [vmem:[#allocation5 + $0x410] sm:$0xff]  ;;  %v632_v32 = vld [vmem:[#allocation5 + $0x418] sm:$0xff]  ;;  %v633_v33 = vld [vmem:[#allocation5 + $0x420] sm:$0xff] }
  0x65   :  { %1410 = vmatprep.subr.bf16.mxu1 %v1632_v50  ;;  %v1453_v34 = vpack.c.bf16 %v632_v32, %v631_v31  ;;  %v634_v35 = vld [vmem:[#allocation5 + $0x428] sm:$0xff]  ;;  %v635_v37 = vld [vmem:[#allocation5 + $0x430] sm:$0xff]  ;;  %v636_v38 = vld [vmem:[#allocation5 + $0x438] sm:$0xff] }
  0x66   :  { %1384 = vmatpush3.bf16.msra.mxu0 %v1383_v4  ;;  %v1441_v4 = vpack.c.bf16 %v548_v3, %v547_v2  ;;  %v637_v40 = vld [vmem:[#allocation5 + $0x440] sm:$0xff]  ;;  %v638_v41 = vld [vmem:[#allocation5 + $0x448] sm:$0xff]  ;;  %v639_v43 = vld [vmem:[#allocation5 + $0x450] sm:$0xff] }
  0x67   :  { %1386 = vmatprep.subr.bf16.mxu0 %v1385_v5  ;;  %v549_v5 = vld [vmem:[#allocation5 + $0x3e0] sm:$0xff]  ;;  %v640_v44 = vld [vmem:[#allocation5 + $0x458] sm:$0xff]  ;;  %v642_v47 = vld [vmem:[#allocation5 + $0x468] sm:$0xff] }
  0x68   :  { %1412 = vmatpush3.bf16.msra.mxu1 %v1411_v36  ;;  %v1444_v7 = vpack.c.bf16 %v550_v6, %v549_v5  ;;  %v1456_v36 = vpack.c.bf16 %v634_v35, %v633_v33  ;;  %v641_v46 = vld [vmem:[#allocation5 + $0x460] sm:$0xff]  ;;  %v643_v49 = vld [vmem:[#allocation5 + $0x470] sm:$0xff]  ;;  %v644_v51 = vld [vmem:[#allocation5 + $0x478] sm:$0xff] }
  0x69   :  { %1413 = vmatprep.subr.bf16.mxu1 %v1632_v50  ;;  %v925_v53 = vld [vmem:[#allocation7 + $0x1] ss:$0 sm:$0xff]  ;;  %v646_v59 = vld [vmem:[#allocation5 + $0x488] sm:$0xff]  ;;  %v724_v63 = vld [vmem:[#allocation5 + $0x498] sm:$0xff] }
  0x6a   :  { %1388 = vmatpush3.bf16.msra.mxu0 %v1387_v10  ;;  %v1447_v10 = vpack.c.bf16 %v552_v9, %v551_v8  ;;  %v725_v0 = vld [vmem:[#allocation5 + $0x4a0] sm:$0xff]  ;;  %v726_v2 = vld [vmem:[#allocation5 + $0x4a8] sm:$0xff]  ;;  %v728_v5 = vld [vmem:[#allocation5 + $0x4b8] sm:$0xff] }
  0x6b   :  { %1390 = vmatprep.subr.bf16.mxu0 %v1389_v11  ;;  %v1480_v3 = vpack.c.bf16 %v726_v2, %v725_v0  ;;  %v730_v8 = vld [vmem:[#allocation5 + $0x4c8] sm:$0xff]  ;;  %v816_v28 = vld [vmem:[#allocation5 + $0x518] sm:$0xff]  ;;  %v817_v29 = vld [vmem:[#allocation5 + $0x520] sm:$0xff] }
  0x6c   :  { %1415 = vmatpush3.bf16.msra.mxu1 %v1414_v39  ;;  %v1459_v39 = vpack.c.bf16 %v636_v38, %v635_v37  ;;  %v818_v31 = vld [vmem:[#allocation5 + $0x528] sm:$0xff]  ;;  %v819_v33 = vld [vmem:[#allocation5 + $0x530] sm:$0xff] }
  0x6d   :  { %1416 = vmatprep.subr.bf16.mxu1 %v1632_v50  ;;  %v1504_v32 = vpack.c.bf16 %v818_v31, %v817_v29  ;;  %v823_v38 = vld [vmem:[#allocation5 + $0x550] sm:$0xff] }
  0x6e   :  { %1392 = vmatpush3.bf16.msra.mxu0 %v1391_v16 }
  0x6f   :  { %1394 = vmatprep.subr.bf16.mxu0 %v1393_v17 }
  0x70   :  { %1418 = vmatpush3.bf16.msra.mxu1 %v1417_v42  ;;  %v1462_v42 = vpack.c.bf16 %v638_v41, %v637_v40  ;;  %v825_v41 = vld [vmem:[#allocation5 + $0x560] sm:$0xff] }
  0x71   :  { %1419 = vmatprep.subr.bf16.mxu1 %v1632_v50 }
  0x72   :  { %1396 = vmatpush3.bf16.msra.mxu0 %v1395_v22 }
  0x73   :  { %1398 = vmatprep.subr.bf16.mxu0 %v1397_v23 }
  0x74   :  { %1421 = vmatpush3.bf16.msra.mxu1 %v1420_v45  ;;  %v1465_v45 = vpack.c.bf16 %v640_v44, %v639_v43  ;;  %v827_v44 = vld [vmem:[#allocation5 + $0x570] sm:$0xff] }
  0x75   :  { %1422 = vmatprep.subr.bf16.mxu1 %v1632_v50 }
  0x76   :  { %1400 = vmatpush3.bf16.msra.mxu0 %v1399_v26 }
  0x77   :  { %1428 = vmatprep.subr.bf16.mxu0 %v1632_v50 }
  0x78   :  { %1424 = vmatpush3.bf16.msra.mxu1 %v1423_v48  ;;  %v1468_v48 = vpack.c.bf16 %v642_v47, %v641_v46  ;;  %v927_v47 = vld [vmem:[#allocation7 + $0x3] ss:$0 sm:$0xff] }
  0x79   :  { %371 = vmatmul.mubr.f32.vlgmr.msra.gmra.mrb[2].mxu0 %v56_v27  ;;  %1425 = vmatprep.subr.bf16.mxu1 %v1632_v50 }
  0x7a   :  { %1197 = vmatprep.mubr.msk.f32.mxu0 %vm1633_vm0, %v1634_v60  ;;  %1430 = vmatpush3.bf16.msra.mxu0 %v1429_v56 }
  0x7b   :  { %1431 = vmatprep.subr.bf16.mxu0 %v1632_v50 }
  0x7c   :  { %1427 = vmatpush3.bf16.msra.mxu1 %v1426_v52  ;;  %v1471_v52 = vpack.c.bf16 %v644_v51, %v643_v49 }
  0x7d   :  { %1452 = vmatprep.subr.bf16.mxu1 %v1632_v50 }
  0x7e   :  { %1433 = vmatpush3.bf16.msra.mxu0 %v1432_v58  ;;  %v645_v58 = vld [vmem:[#allocation5 + $0x480] sm:$0xff] }
  0x7f   :  { %1434 = vmatprep.subr.bf16.mxu0 %v1632_v50  ;;  %v1474_v61 = vpack.c.bf16 %v646_v59, %v645_v58 }
  0x82   :  { %1436 = vmatpush3.bf16.msra.mxu0 %v1435_v62  ;;  %v723_v62 = vld [vmem:[#allocation5 + $0x490] sm:$0xff] }
  0x83   :  { %1437 = vmatprep.subr.bf16.mxu0 %v1632_v50 }
  0x86   :  { %1439 = vmatpush3.bf16.msra.mxu0 %v1438_v1  ;;  %v1477_v1 = vpack.c.bf16 %v724_v63, %v723_v62  ;;  %v929_v62 = vld [vmem:[#allocation7 + $0x5] ss:$0 sm:$0xff] }
  0x87   :  { %1440 = vmatprep.subr.bf16.mxu0 %v1632_v50 }
  0x8a   :  { %1442 = vmatpush3.bf16.msra.mxu0 %v1441_v4  ;;  %v727_v4 = vld [vmem:[#allocation5 + $0x4b0] sm:$0xff] }
  0x8b   :  { %1443 = vmatprep.subr.bf16.mxu0 %v1632_v50  ;;  %v1483_v6 = vpack.c.bf16 %v728_v5, %v727_v4 }
  0x8e   :  { %1445 = vmatpush3.bf16.msra.mxu0 %v1444_v7  ;;  %v729_v7 = vld [vmem:[#allocation5 + $0x4c0] sm:$0xff] }
  0x8f   :  { %1446 = vmatprep.subr.bf16.mxu0 %v1632_v50  ;;  %v1486_v9 = vpack.c.bf16 %v730_v8, %v729_v7 }
  0x92   :  { %1448 = vmatpush3.bf16.msra.mxu0 %v1447_v10  ;;  %v731_v10 = vld [vmem:[#allocation5 + $0x4d0] sm:$0xff] }
  0x93   :  { %1449 = vmatprep.subr.bf16.mxu0 %v1632_v50 }
  0x96   :  { %1451 = vmatpush3.bf16.msra.mxu0 %v1450_v30 }
  0x97   :  { %1476 = vmatprep.subr.bf16.mxu0 %v1632_v50 }
 0x12c   :  { %v962_v11 = vpop.f32.mrb[0].mxu0 }
 0x12d   :  { %v963_v13 = vpop.f32.mrb[1].mxu0 }
 0x12e   :  { %v997_v14 = vpop.f32.mrb[0].mxu1  ;;  %v964_v15 = vadd.f32 %v963_v13, %v962_v11  ;;  %v732_v11 = vld [vmem:[#allocation5 + $0x4d8] sm:$0xff]  ;;  %v733_v13 = vld [vmem:[#allocation5 + $0x4e0] sm:$0xff] }
 0x12f   :  { %v998_v16 = vpop.f32.mrb[1].mxu1 }
 0x130   :  { %v999_v17 = vadd.f32 %v998_v16, %v997_v14  ;;  %v233_v18 = vadd.f32 %v964_v15, %v923_v12  ;;  %v1489_v12 = vpack.c.bf16 %v732_v11, %v731_v10  ;;  %v734_v14 = vld [vmem:[#allocation5 + $0x4e8] sm:$0xff]  ;;  %v735_v16 = vld [vmem:[#allocation5 + $0x4f0] sm:$0xff] }
 0x131   :  { %v1492_v15 = vpack.c.bf16 %v734_v14, %v733_v13 }
 0x132   :  { %v303_v19 = vadd.f32 %v999_v17, %v233_v18  ;;  %v442_v20 = vpop.f32.mrb[2].mxu1  ;;  %v736_v17 = vld [vmem:[#allocation5 + $0x4f8] sm:$0xff] }
 0x133   :  { %v1129_v21 = vpop.f32.mrb[3].mxu1  ;;  %v1495_v18 = vpack.c.bf16 %v736_v17, %v735_v16 }
 0x14c   :  { %v1032_v22 = vpop.f32.mrb[2].mxu0 }
 0x14d   :  { %v1033_v23 = vpop.f32.mrb[3].mxu0 }
 0x14e   :  { %v1034_v24 = vadd.f32 %v1033_v23, %v1032_v22 }
 0x150   :  { %v373_v25 = vadd.f32 %v1034_v24, %v303_v19  ;;  %v926_v19 = vld [vmem:[#allocation7 + $0x2] ss:$0 sm:$0xff]  ;;  %v737_v24 = vld [vmem:[#allocation5 + $0x500] sm:$0xff] }
 0x152   :  { %v443_v26 = vadd.f32 %v442_v20, %v373_v25  ;;  %v738_v25 = vld [vmem:[#allocation5 + $0x508] sm:$0xff] }
 0x154   :  { %v446_v27 = vmax.f32 %v443_v26, 0.0  ;;  %v1498_v26 = vpack.c.bf16 %v738_v25, %v737_v24 }
 0x156   :  { %1163 = vmatmul.mubr.f32.vlgmr.msra.gmra.mrb[4].mxu1 %v446_v27  ;;  %v815_v27 = vld [vmem:[#allocation5 + $0x510] sm:$0xff] }
 0x157   :  { %1232 = vmatprep.mubr.msk.f32.mxu1 %vm1633_vm0, %v1634_v60  ;;  %1454 = vmatpush3.bf16.msra.mxu1 %v1453_v34  ;;  %v1501_v30 = vpack.c.bf16 %v816_v28, %v815_v27  ;;  %v820_v34 = vld [vmem:[#allocation5 + $0x538] sm:$0xff] }
 0x158   :  { %1455 = vmatprep.subr.bf16.mxu1 %v1632_v50  ;;  %v1507_v35 = vpack.c.bf16 %v820_v34, %v819_v33 }
 0x15b   :  { %1457 = vmatpush3.bf16.msra.mxu1 %v1456_v36  ;;  %v822_v36 = vld [vmem:[#allocation5 + $0x548] sm:$0xff] }
 0x15c   :  { %1458 = vmatprep.subr.bf16.mxu1 %v1632_v50 }
 0x15f   :  { %1460 = vmatpush3.bf16.msra.mxu1 %v1459_v39  ;;  %v824_v39 = vld [vmem:[#allocation5 + $0x558] sm:$0xff] }
 0x160   :  { %1461 = vmatprep.subr.bf16.mxu1 %v1632_v50  ;;  %v1513_v40 = vpack.c.bf16 %v824_v39, %v823_v38 }
 0x163   :  { %1463 = vmatpush3.bf16.msra.mxu1 %v1462_v42  ;;  %v826_v42 = vld [vmem:[#allocation5 + $0x568] sm:$0xff] }
 0x164   :  { %1464 = vmatprep.subr.bf16.mxu1 %v1632_v50  ;;  %v1516_v43 = vpack.c.bf16 %v826_v42, %v825_v41 }
 0x167   :  { %1466 = vmatpush3.bf16.msra.mxu1 %v1465_v45  ;;  %v828_v45 = vld [vmem:[#allocation5 + $0x578] sm:$0xff] }
 0x168   :  { %1467 = vmatprep.subr.bf16.mxu1 %v1632_v50  ;;  %v1519_v46 = vpack.c.bf16 %v828_v45, %v827_v44 }
 0x16b   :  { %1469 = vmatpush3.bf16.msra.mxu1 %v1468_v48 }
 0x16c   :  { %1470 = vmatprep.subr.bf16.mxu1 %v1632_v50 }
 0x16f   :  { %1472 = vmatpush3.bf16.msra.mxu1 %v1471_v52 }
 0x170   :  { %1473 = vmatprep.subr.bf16.mxu1 %v1632_v50 }
 0x173   :  { %1475 = vmatpush3.bf16.msra.mxu1 %v1474_v61 }
 0x174   :  { %1500 = vmatprep.subr.bf16.mxu1 %v1632_v50 }
 0x229   :  { %v534_v54 = vpop.f32.mrb[4].mxu1 }
 0x22a   :  { %v535_v55 = vadd.f32 %v925_v53, %v534_v54  ;;  %v1164_v56 = vpop.f32.mrb[5].mxu1  ;;  %v829_v53 = vld [vmem:[#allocation5 + $0x580] sm:$0xff]  ;;  %v830_v54 = vld [vmem:[#allocation5 + $0x588] sm:$0xff] }
 0x22b   :  { %v928_v56 = vld [vmem:[#allocation7 + $0x4] ss:$0 sm:$0xff] }
 0x22c   :  { %v538_v57 = vmax.f32 %v535_v55, 0.0  ;;  %v1522_v55 = vpack.c.bf16 %v830_v54, %v829_v53 }
 0x22e   :  { %1198 = vmatmul.mubr.f32.vlgmr.msra.gmra.mrb[4].mxu0 %v538_v57 }
 0x22f   :  { %1267 = vmatprep.mubr.msk.f32.mxu0 %vm1633_vm0, %v1634_v60  ;;  %1478 = vmatpush3.bf16.msra.mxu0 %v1477_v1 }
 0x230   :  { %1479 = vmatprep.subr.bf16.mxu0 %v1632_v50 }
 0x233   :  { %1481 = vmatpush3.bf16.msra.mxu0 %v1480_v3 }
 0x234   :  { %1482 = vmatprep.subr.bf16.mxu0 %v1632_v50 }
 0x237   :  { %1484 = vmatpush3.bf16.msra.mxu0 %v1483_v6 }
 0x238   :  { %1485 = vmatprep.subr.bf16.mxu0 %v1632_v50 }
 0x23b   :  { %1487 = vmatpush3.bf16.msra.mxu0 %v1486_v9 }
 0x23c   :  { %1488 = vmatprep.subr.bf16.mxu0 %v1632_v50 }
 0x23f   :  { %1490 = vmatpush3.bf16.msra.mxu0 %v1489_v12 }
 0x240   :  { %1491 = vmatprep.subr.bf16.mxu0 %v1632_v50 }
 0x243   :  { %1493 = vmatpush3.bf16.msra.mxu0 %v1492_v15 }
 0x244   :  { %1494 = vmatprep.subr.bf16.mxu0 %v1632_v50 }
 0x247   :  { %1496 = vmatpush3.bf16.msra.mxu0 %v1495_v18 }
 0x248   :  { %1497 = vmatprep.subr.bf16.mxu0 %v1632_v50 }
 0x24b   :  { %1499 = vmatpush3.bf16.msra.mxu0 %v1498_v26 }
 0x301   :  { %v626_v20 = vpop.f32.mrb[4].mxu0 }
 0x302   :  { %v627_v21 = vadd.f32 %v926_v19, %v626_v20  ;;  %v1199_v22 = vpop.f32.mrb[5].mxu0 }
 0x304   :  { %v630_v23 = vmax.f32 %v627_v21, 0.0 }
 0x306   :  { %1233 = vmatmul.mubr.f32.vlgmr.msra.gmra.mrb[6].mxu1 %v630_v23 }
 0x307   :  { %1302 = vmatprep.mubr.msk.f32.mxu1 %vm1633_vm0, %v1634_v60  ;;  %1502 = vmatpush3.bf16.msra.mxu1 %v1501_v30  ;;  %v821_v60 = vld [vmem:[#allocation5 + $0x540] sm:$0xff] }
 0x308   :  { %1503 = vmatprep.subr.bf16.mxu1 %v1632_v50  ;;  %v1510_v37 = vpack.c.bf16 %v822_v36, %v821_v60 }
 0x30b   :  { %1505 = vmatpush3.bf16.msra.mxu1 %v1504_v32 }
 0x30c   :  { %1506 = vmatprep.subr.bf16.mxu1 %v1632_v50 }
 0x30f   :  { %1508 = vmatpush3.bf16.msra.mxu1 %v1507_v35 }
 0x310   :  { %1509 = vmatprep.subr.bf16.mxu1 %v1632_v50 }
 0x313   :  { %1511 = vmatpush3.bf16.msra.mxu1 %v1510_v37 }
 0x314   :  { %1512 = vmatprep.subr.bf16.mxu1 %v1632_v50 }
 0x317   :  { %1514 = vmatpush3.bf16.msra.mxu1 %v1513_v40 }
 0x318   :  { %1515 = vmatprep.subr.bf16.mxu1 %v1632_v50 }
 0x31b   :  { %1517 = vmatpush3.bf16.msra.mxu1 %v1516_v43 }
 0x31c   :  { %1518 = vmatprep.subr.bf16.mxu1 %v1632_v50 }
 0x31f   :  { %1520 = vmatpush3.bf16.msra.mxu1 %v1519_v46 }
 0x320   :  { %1521 = vmatprep.subr.bf16.mxu1 %v1632_v50 }
 0x323   :  { %1523 = vmatpush3.bf16.msra.mxu1 %v1522_v55 }
 0x3d9   :  { %v718_v48 = vpop.f32.mrb[6].mxu1 }
 0x3da   :  { %v719_v49 = vadd.f32 %v927_v47, %v718_v48  ;;  %v1234_v51 = vpop.f32.mrb[7].mxu1 }
 0x3dc   :  { %v722_v52 = vmax.f32 %v719_v49, 0.0 }
 0x3de   :  { %1268 = vmatmul.mubr.f32.vlgmr.msra.gmra.mrb[6].mxu0 %v722_v52 }
 0x4b1   :  { %v810_v57 = vpop.f32.mrb[6].mxu0 }
 0x4b2   :  { %v811_v58 = vadd.f32 %v928_v56, %v810_v57  ;;  %v1269_v59 = vpop.f32.mrb[7].mxu0 }
 0x4b4   :  { %v814_v61 = vmax.f32 %v811_v58, 0.0 }
 0x4b6   :  { %1303 = vmatmul.mubr.f32.vlgmr.msra.gmra.mrb[8].mxu1 %v814_v61 }
 0x589   :  { %v902_v50 = vpop.f32.mrb[8].mxu1 }
 0x58a   :  { %v903_v63 = vadd.f32 %v929_v62, %v902_v50  ;;  %v1304_v0 = vpop.f32.mrb[9].mxu1 }
 0x58c   :  { %906 = vst [vmem:[#allocation8] sm:$0xff] %v903_v63 }
 0x58d   :  { %1610 = shalt.err (!%p1607_p0)
}
 0x58e   :  { %s1611_s25 = scalar_lea.hbm %s1760_s3, 128 }
 0x58f   :  { %p1612_p1 = scmp.ne.s32.totalorder %s1760_s3, %s1611_s25  ;;  %p1615_p2 = scmp.lt.u32.totalorder %s1611_s25, %s1760_s3 }
 0x591   :  { %p1617_p3 = pnand %p1615_p2, %p1612_p1 }
 0x593   :  { %1620 = shalt.err (!%p1617_p3)
}
 0x594   :  { %916 = dma.vmem_to_hbm [thread:$0]  %s914_s21, 128, %s1760_s3, [#allocation4]  }
 0x595   :  { %1625 = dma.done.wait [#allocation4], 128  }
 0x596   :  { %1626 = vsyncadd [#allocation4], 4294967168 }
 0x597   :  { %920 = vsyncpa [#allocation3], 1 }
 0x598   :  { %921 = vsyncpa [#allocation6], 1 }
 0x599   :  { %922 = vsyncpa [#allocation4], 1 }

</bundles_post_ra>
